<compile_context>
chip_gen: v7x
topology: tpu7x:2x2x1
jax: 0.10.0
libtpu: 0.0.40
codegen_flags: <defaults>
</compile_context>

<pallas_src>
import functools

import jax
import jax.numpy as jnp
import numpy as np
from jax.experimental import pallas as pl
from jax.experimental.pallas import tpu as pltpu


def _non_local_kernel(x_ref, m_ref,
                      wg_ref, bg_ref, wfi_ref, bfi_ref, ws_ref, bs_ref,
                      out_ref, *, use_exp):
    """One (batch, spatial-tile) step.  All activations are channels-last (lane-dense)."""
    m = m_ref[0]                                                            # (tile_hw, C_in)

    # 1x1 convs == per-pixel matmuls over the channel (lane) axis. Weights were
    # pre-transposed to (in, out) in the wrapper, so no in-kernel transposes.
    g = jnp.dot(m, wg_ref[...], preferred_element_type=jnp.float32) + bg_ref[...]    # (tile_hw, C_out)
    js = jnp.dot(m, wfi_ref[...], preferred_element_type=jnp.float32) + bfi_ref[...]  # (tile_hw, c_r)

    # sita(x) for this batch element: (1, C_in) @ (C_in, c_r)
    i = jnp.dot(x_ref[0], ws_ref[...], preferred_element_type=jnp.float32) + bs_ref[...]  # (1, c_r)

    # f[p] = sum_c i[c] * js[p, c]  ==  bmm(i.unsqueeze(1), js.view(b, c, hw))
    # lane-axis reduction -> XLU slot, leaves the VALU free.
    f = jnp.sum(js * i, axis=-1, keepdims=True)                             # (tile_hw, 1)
    if use_exp:                                                             # 'Embedded Gaussian'
        f = jnp.exp(f)                                                      # EUP slot

    out = f * g + m.astype(jnp.float32)                                     # residual
    out_ref[...] = out[None].astype(out_ref.dtype)


def non_local_layer(map_nchw, x, params, *, non_local_type="Embedded Gaussian",
                    tile_hw=512, compute_dtype=jnp.float32):
    """Pallas NonLocalLayer forward.

    map_nchw: (B, C_in, H, W) float32      x: (B, C_in) float32
    params  : (wg, bg, wfi, bfi, ws, bs) with weights pre-transposed to (in, out).
    """
    if non_local_type not in ("Dot", "Embedded Gaussian"):
        # TODO(synk): 'Concatenation' path (Conv2d over [i, js] concat + ReLU) not implemented.
        raise NotImplementedError(non_local_type)

    wg, bg, wfi, bfi, ws, bs = params
    B, C_in, H, W = map_nchw.shape
    C_out = wg.shape[1]
    assert C_out == C_in, "residual `f*g + map` requires out_ch == in_ch"
    HW = H * W

    tile_hw = min(tile_hw, HW)
    assert HW % tile_hw == 0 and (tile_hw % 8 == 0 or tile_hw == HW)
    n_hw = HW // tile_hw

    cd = compute_dtype
    # Layout plumbing lives in the wrapper: NCHW -> (B, HW, C) channels-last so the channel
    # axis is the lane axis and every kernel load/store is a dense slab.
    m_hw = jnp.transpose(map_nchw, (0, 2, 3, 1)).reshape(B, HW, C_in).astype(cd)
    x3 = x.reshape(B, 1, C_in).astype(cd)
    wp = [p.astype(cd) for p in params]

    kernel = functools.partial(_non_local_kernel,
                               use_exp=(non_local_type == "Embedded Gaussian"))

    def full(p):  # small parameters stay resident (constant index map) across all grid steps
        return pl.BlockSpec(p.shape, lambda b, s: (0, 0))

    out = pl.pallas_call(
        kernel,
        out_shape=jax.ShapeDtypeStruct((B, HW, C_out), jnp.float32),
        grid=(B, n_hw),
        in_specs=[
            pl.BlockSpec((1, 1, C_in), lambda b, s: (b, 0, 0)),        # x row for batch b
            pl.BlockSpec((1, tile_hw, C_in), lambda b, s: (b, s, 0)),  # map spatial tile
            full(wp[0]), full(wp[1]),                                  # g_net  W, b
            full(wp[2]), full(wp[3]),                                  # fi     W, b
            full(wp[4]), full(wp[5]),                                  # sita   W, b
        ],
        out_specs=pl.BlockSpec((1, tile_hw, C_out), lambda b, s: (b, s, 0)),
        compiler_params=pltpu.CompilerParams(
            dimension_semantics=("parallel", "parallel")),              # megacore-friendly grid
    )(x3, m_hw, *wp)

    return out.reshape(B, H, W, C_out).transpose(0, 3, 1, 2)            # back to NCHW


def init_params(key, in_ch, out_ch, reduction=1):
    """Deterministic parameters; weights stored pre-transposed as (in, out)."""
    c_r = in_ch // reduction
    keys = jax.random.split(key, 6)
    s = 1.0 / in_ch
    wg = s * jax.random.normal(keys[0], (in_ch, out_ch), jnp.float32)
    bg = s * jax.random.normal(keys[1], (1, out_ch), jnp.float32)
    wfi = s * jax.random.normal(keys[2], (in_ch, c_r), jnp.float32)
    bfi = s * jax.random.normal(keys[3], (1, c_r), jnp.float32)
    ws = s * jax.random.normal(keys[4], (in_ch, c_r), jnp.float32)
    bs = s * jax.random.normal(keys[5], (1, c_r), jnp.float32)
    return (wg, bg, wfi, bfi, ws, bs)


def _reference(map_nchw, x, params, non_local_type):
    """Pure-JAX mirror of the PyTorch forward (channels-first, full precision)."""
    wg, bg, wfi, bfi, ws, bs = params
    B, C_in, H, W = map_nchw.shape
    c_r = wfi.shape[1]
    hp = jax.lax.Precision.HIGHEST
    g = jnp.einsum('bchw,co->bohw', map_nchw, wg, precision=hp) + bg.reshape(1, -1, 1, 1)
    js = jnp.einsum('bchw,co->bohw', map_nchw, wfi, precision=hp) + bfi.reshape(1, -1, 1, 1)
    i = (jnp.dot(x, ws, precision=hp) + bs)[:, None, :]                       # (B, 1, c_r)
    f = jnp.einsum('bic,bcp->bip', i, js.reshape(B, c_r, H * W), precision=hp)  # (B, 1, HW)
    if non_local_type == "Embedded Gaussian":
        f = jnp.exp(f)
    f = f.reshape(B, 1, H, W)
    return f * g + map_nchw


if __name__ == "__main__":
    B, C_in, C_out, H, W = 2, 32, 32, 16, 16

    key = jax.random.PRNGKey(0)
    k_param, k_map, k_x = jax.random.split(key, 3)
    params = init_params(k_param, C_in, C_out, reduction=1)
    map_nchw = jax.random.normal(k_map, (B, C_in, H, W), jnp.float32)
    x = jax.random.normal(k_x, (B, C_in), jnp.float32)

    # float32 compute path — tight check for both supported nonLocalType branches.
    for nlt in ("Embedded Gaussian", "Dot"):
        out = non_local_layer(map_nchw, x, params, non_local_type=nlt, tile_hw=128)
        out = jax.block_until_ready(out)
        ref = _reference(map_nchw, x, params, nlt)
        np.testing.assert_allclose(np.asarray(out), np.asarray(ref), rtol=1e-4, atol=1e-4)

    # bf16 compute path (per perf feedback): bf16 MXU inputs, f32 accumulation.
    out_bf = non_local_layer(map_nchw, x, params, non_local_type="Embedded Gaussian",
                             tile_hw=128, compute_dtype=jnp.bfloat16)
    out_bf = jax.block_until_ready(out_bf)
    to_bf = lambda a: a.astype(jnp.bfloat16).astype(jnp.float32)
    ref_bf = _reference(to_bf(map_nchw), to_bf(x), [to_bf(p) for p in params],
                        "Embedded Gaussian")
    np.testing.assert_allclose(np.asarray(out_bf), np.asarray(ref_bf), rtol=2e-2, atol=2e-2)

    print("KERNEL_OK")
</pallas_src>

<mosaic_0001>
module attributes {stable_mosaic.version = 11 : i64} {
  func.func @_non_local_kernel(%arg0: i32, %arg1: i32, %arg2: memref<1x1x32xf32, #tpu.memory_space<vmem>>, %arg3: memref<1x128x32xf32, #tpu.memory_space<vmem>>, %arg4: memref<32x32xf32, #tpu.memory_space<vmem>>, %arg5: memref<1x32xf32, #tpu.memory_space<vmem>>, %arg6: memref<32x32xf32, #tpu.memory_space<vmem>>, %arg7: memref<1x32xf32, #tpu.memory_space<vmem>>, %arg8: memref<32x32xf32, #tpu.memory_space<vmem>>, %arg9: memref<1x32xf32, #tpu.memory_space<vmem>>, %arg10: memref<1x128x32xf32, #tpu.memory_space<vmem>>) attributes {dimension_semantics = [#tpu.dimension_semantics<parallel>, #tpu.dimension_semantics<parallel>], iteration_bounds = array<i64: 2, 2>, scalar_prefetch = 0 : i64, scratch_operands = 0 : i64, tpu.core_type = #tpu.core_type<tc>, window_params = [{transform_indices = @transform_0, window_bounds = array<i64: 1, 1, 32>}, {transform_indices = @transform_1, window_bounds = array<i64: 1, 128, 32>}, {pipeline_mode = #tpu.pipeline_mode<synchronous>, transform_indices = @transform_2, window_bounds = array<i64: 32, 32>}, {pipeline_mode = #tpu.pipeline_mode<synchronous>, transform_indices = @transform_3, window_bounds = array<i64: 1, 32>}, {pipeline_mode = #tpu.pipeline_mode<synchronous>, transform_indices = @transform_4, window_bounds = array<i64: 32, 32>}, {pipeline_mode = #tpu.pipeline_mode<synchronous>, transform_indices = @transform_5, window_bounds = array<i64: 1, 32>}, {pipeline_mode = #tpu.pipeline_mode<synchronous>, transform_indices = @transform_6, window_bounds = array<i64: 32, 32>}, {pipeline_mode = #tpu.pipeline_mode<synchronous>, transform_indices = @transform_7, window_bounds = array<i64: 1, 32>}, {transform_indices = @transform_8, window_bounds = array<i64: 1, 128, 32>}]} {
    %c0 = arith.constant 0 : index
    %c0_0 = arith.constant 0 : index
    %c0_1 = arith.constant 0 : index
    %0 = vector.load %arg3[%c0, %c0_0, %c0_1] : memref<1x128x32xf32, #tpu.memory_space<vmem>>, vector<1x128x32xf32>
    %1 = vector.shape_cast %0 : vector<1x128x32xf32> to vector<128x32xf32>
    %c0_2 = arith.constant 0 : index
    %c0_3 = arith.constant 0 : index
    %2 = vector.load %arg4[%c0_2, %c0_3] : memref<32x32xf32, #tpu.memory_space<vmem>>, vector<32x32xf32>
    %cst = arith.constant dense<0.000000e+00> : vector<128x32xf32>
    %3 = tpu.matmul %1, %2, %cst {dimension_numbers = #tpu.dot_dimension_numbers<[1], [0], [0], [1], [0, 0, 1, 1], [], []>} : vector<128x32xf32>, vector<32x32xf32>, vector<128x32xf32> -> vector<128x32xf32>
    %c0_4 = arith.constant 0 : index
    %c0_5 = arith.constant 0 : index
    %4 = vector.load %arg5[%c0_4, %c0_5] : memref<1x32xf32, #tpu.memory_space<vmem>>, vector<1x32xf32>
    %5 = vector.broadcast %4 : vector<1x32xf32> to vector<128x32xf32>
    %6 = arith.addf %3, %5 : vector<128x32xf32>
    %c0_6 = arith.constant 0 : index
    %c0_7 = arith.constant 0 : index
    %7 = vector.load %arg6[%c0_6, %c0_7] : memref<32x32xf32, #tpu.memory_space<vmem>>, vector<32x32xf32>
    %cst_8 = arith.constant dense<0.000000e+00> : vector<128x32xf32>
    %8 = tpu.matmul %1, %7, %cst_8 {dimension_numbers = #tpu.dot_dimension_numbers<[1], [0], [0], [1], [0, 0, 1, 1], [], []>} : vector<128x32xf32>, vector<32x32xf32>, vector<128x32xf32> -> vector<128x32xf32>
    %c0_9 = arith.constant 0 : index
    %c0_10 = arith.constant 0 : index
    %9 = vector.load %arg7[%c0_9, %c0_10] : memref<1x32xf32, #tpu.memory_space<vmem>>, vector<1x32xf32>
    %10 = vector.broadcast %9 : vector<1x32xf32> to vector<128x32xf32>
    %11 = arith.addf %8, %10 : vector<128x32xf32>
    %c0_11 = arith.constant 0 : index
    %c0_12 = arith.constant 0 : index
    %c0_13 = arith.constant 0 : index
    %12 = vector.load %arg2[%c0_11, %c0_12, %c0_13] : memref<1x1x32xf32, #tpu.memory_space<vmem>>, vector<1x1x32xf32>
    %13 = vector.shape_cast %12 : vector<1x1x32xf32> to vector<1x32xf32>
    %c0_14 = arith.constant 0 : index
    %c0_15 = arith.constant 0 : index
    %14 = vector.load %arg8[%c0_14, %c0_15] : memref<32x32xf32, #tpu.memory_space<vmem>>, vector<32x32xf32>
    %cst_16 = arith.constant dense<0.000000e+00> : vector<1x32xf32>
    %15 = tpu.matmul %13, %14, %cst_16 {dimension_numbers = #tpu.dot_dimension_numbers<[1], [0], [0], [1], [0, 0, 1, 1], [], []>} : vector<1x32xf32>, vector<32x32xf32>, vector<1x32xf32> -> vector<1x32xf32>
    %c0_17 = arith.constant 0 : index
    %c0_18 = arith.constant 0 : index
    %16 = vector.load %arg9[%c0_17, %c0_18] : memref<1x32xf32, #tpu.memory_space<vmem>>, vector<1x32xf32>
    %17 = arith.addf %15, %16 : vector<1x32xf32>
    %18 = vector.broadcast %17 : vector<1x32xf32> to vector<128x32xf32>
    %19 = arith.mulf %11, %18 : vector<128x32xf32>
    %cst_19 = arith.constant dense<0.000000e+00> : vector<128xf32>
    %20 = vector.multi_reduction <add>, %19, %cst_19 [1] : vector<128x32xf32> to vector<128xf32>
    %21 = vector.shape_cast %20 : vector<128xf32> to vector<128x1xf32>
    %22 = math.exp %21 : vector<128x1xf32>
    %23 = vector.broadcast %22 : vector<128x1xf32> to vector<128x32xf32>
    %24 = arith.mulf %23, %6 : vector<128x32xf32>
    %25 = arith.addf %24, %1 : vector<128x32xf32>
    %26 = vector.shape_cast %25 : vector<128x32xf32> to vector<1x128x32xf32>
    %c0_20 = arith.constant 0 : index
    %c0_21 = arith.constant 0 : index
    %c0_22 = arith.constant 0 : index
    %27 = vector.load %arg10[%c0_20, %c0_21, %c0_22] : memref<1x128x32xf32, #tpu.memory_space<vmem>>, vector<1x128x32xf32>
    tpu.vector_store %arg10[%c0_20, %c0_21, %c0_22], %26 {strides = array<i32>} : memref<1x128x32xf32, #tpu.memory_space<vmem>>, vector<1x128x32xf32>,
    return
  }
  func.func @transform_0(%arg0: i32, %arg1: i32) -> (i32, i32, i32) {
    %c0_i32 = arith.constant 0 : i32
    %c0_i32_0 = arith.constant 0 : i32
    %c0_i32_1 = arith.constant 0 : i32
    return %arg0, %c0_i32, %c0_i32_0 : i32, i32, i32
  }
  func.func @transform_1(%arg0: i32, %arg1: i32) -> (i32, i32, i32) {
    %c0_i32 = arith.constant 0 : i32
    %c0_i32_0 = arith.constant 0 : i32
    return %arg0, %arg1, %c0_i32 : i32, i32, i32
  }
  func.func @transform_2(%arg0: i32, %arg1: i32) -> (i32, i32) {
    %c0_i32 = arith.constant 0 : i32
    %c0_i32_0 = arith.constant 0 : i32
    %c0_i32_1 = arith.constant 0 : i32
    return %c0_i32, %c0_i32_0 : i32, i32
  }
  func.func @transform_3(%arg0: i32, %arg1: i32) -> (i32, i32) {
    %c0_i32 = arith.constant 0 : i32
    %c0_i32_0 = arith.constant 0 : i32
    %c0_i32_1 = arith.constant 0 : i32
    return %c0_i32, %c0_i32_0 : i32, i32
  }
  func.func @transform_4(%arg0: i32, %arg1: i32) -> (i32, i32) {
    %c0_i32 = arith.constant 0 : i32
    %c0_i32_0 = arith.constant 0 : i32
    %c0_i32_1 = arith.constant 0 : i32
    return %c0_i32, %c0_i32_0 : i32, i32
  }
  func.func @transform_5(%arg0: i32, %arg1: i32) -> (i32, i32) {
    %c0_i32 = arith.constant 0 : i32
    %c0_i32_0 = arith.constant 0 : i32
    %c0_i32_1 = arith.constant 0 : i32
    return %c0_i32, %c0_i32_0 : i32, i32
  }
  func.func @transform_6(%arg0: i32, %arg1: i32) -> (i32, i32) {
    %c0_i32 = arith.constant 0 : i32
    %c0_i32_0 = arith.constant 0 : i32
    %c0_i32_1 = arith.constant 0 : i32
    return %c0_i32, %c0_i32_0 : i32, i32
  }
  func.func @transform_7(%arg0: i32, %arg1: i32) -> (i32, i32) {
    %c0_i32 = arith.constant 0 : i32
    %c0_i32_0 = arith.constant 0 : i32
    %c0_i32_1 = arith.constant 0 : i32
    return %c0_i32, %c0_i32_0 : i32, i32
  }
  func.func @transform_8(%arg0: i32, %arg1: i32) -> (i32, i32, i32) {
    %c0_i32 = arith.constant 0 : i32
    %c0_i32_0 = arith.constant 0 : i32
    return %arg0, %arg1, %c0_i32 : i32, i32, i32
  }
}

</mosaic_0001>

<bundles_post_ra>
// kernel: tpu_custom_call.1
= control target key start
LH: loop header
LB: loop body
LE: loop exit
PB: predicated region body
PF: predicated region fallthrough
CT: control target
= control target key end

     0   :  { %s1415_s27 = smov 0   ;;  %s1417_s28 = smov 0   ;;  %s1775_s0 = inlined_call_operand.vmem [shape: f32[2,1,32], index: 0, kind: input, shape index: {}]   ;;  %s1776_s1 = inlined_call_operand.vmem [shape: f32[2,256,32], index: 1, kind: input, shape index: {}]   ;;  %s1777_s2 = inlined_call_operand.vmem [shape: f32[32,32], index: 2, kind: input, shape index: {}]   ;;  %s1778_s3 = inlined_call_operand.vmem [shape: f32[1,32], index: 3, kind: input, shape index: {}]   ;;  %s1779_s4 = inlined_call_operand.vmem [shape: f32[32,32], index: 4, kind: input, shape index: {}]   ;;  %s1780_s5 = inlined_call_operand.vmem [shape: f32[1,32], index: 5, kind: input, shape index: {}]   ;;  %s1781_s6 = inlined_call_operand.vmem [shape: f32[32,32], index: 6, kind: input, shape index: {}]   ;;  %s1782_s7 = inlined_call_operand.vmem [shape: f32[1,32], index: 7, kind: input, shape index: {}]   ;;  %s1783_s8 = inlined_call_operand.vmem [shape: f32[2,256,32], index: 8, kind: output, shape index: {}]  }
   0x1   :  { %s1419_s29 = smov 0   ;;  %s1421_s30 = smov 0  }
   0x2   :  { %s1423_s9 = smov 0  }
   0x3 LB: > { %s27_s10 = sadd.s32 1, %s1357_s29  ;;  %s30_s11 = sadd.s32 1, %s1361_s30  ;;  %s1365_s9 = sphi %s1423_s9, %s18_s9   ;;  %s1361_s30 = sphi %s1421_s30, %s1808_s30   ;;  %s1357_s29 = sphi %s1419_s29, %s1807_s29   ;;  %s1353_s28 = sphi %s1417_s28, %s1806_s28   ;;  %s1349_s27 = sphi %s1415_s27, %s1805_s27  }
   0x4   : > { %p28_p0 = scmp.ge.s32.totalorder %s27_s10, 2  ;;  %p1066_p1 = scmp.ge.s32.totalorder %s1365_s9, 1 }
   0x5   : > { %p291_p2 = scmp.lt.s32.totalorder %s1365_s9, 5 }
   0x6   : > { %s1810_s10 = smov (%p28_p0, %s27_s10), 0  ;;  %s1812_s11 = smov (!%p28_p0, %s30_s11), %s1361_s30 }
   0x7   : > { %p292_p3 = pnand %p1066_p1, %p291_p2  ;;  %p32_p4 = scmp.ge.s32.totalorder %s1812_s11, 2 }
   0x9   : > { %s1814_s11 = smov (%p32_p4, %s1812_s11), 0  ;;  %295 = sbr.rel (%p292_p3) target bundleno = 467 (0x1d3), region = 52 }
  0x10   : > { %v375_v0 = vld [vmem:[%s1777_s2] sm:$0xff]  ;;  %v376_v1 = vld [vmem:[%s1777_s2 + $0x8] sm:$0xff]  ;;  %v377_v2 = vld [vmem:[%s1777_s2 + $0x10] sm:$0xff]  ;;  %p336_p5 = scmp.lt.s32.totalorder %s1353_s28, 1  ;;  %s1067_s18 = sshll.u32 %s1349_s27, 4  ;;  %vm386_vm0 = vcmask 261120   ;;  %v815_v61 = vlaneseq }
  0x11   : > { %v1230_v3 = vpack.c.bf16 %v376_v1, %v375_v0  ;;  %v378_v4 = vld [vmem:[%s1777_s2 + $0x18] sm:$0xff]  ;;  %v580_v5 = vld [vmem:[%s1779_s4] sm:$0xff]  ;;  %v581_v6 = vld [vmem:[%s1779_s4 + $0x8] sm:$0xff]  ;;  %p342_p6 = scmp.lt.s32.totalorder %s1067_s18, 31  ;;  %v1367_v17 = vmov 0.0|0.0   ;;  %vm1368_vm1 = vmmov 0  }
  0x12   : > { %v1234_v7 = vpack.c.bf16 %v378_v4, %v377_v2  ;;  %v1238_v8 = vpack.c.bf16 %v581_v6, %v580_v5  ;;  %s1816_s28 = smov (!%p336_p5, %s1353_s28), 1  ;;  %v582_v9 = vld [vmem:[%s1779_s4 + $0x10] sm:$0xff]  ;;  %v583_v10 = vld [vmem:[%s1779_s4 + $0x18] sm:$0xff]  ;;  %v737_v12 = vld [vmem:[%s1781_s6] sm:$0xff]  ;;  %v1369_v35 = vmov 0.0   ;;  %v816_v1 = vshrl.u32 %v815_v61, 7 }
  0x13   : > { %1231 = vmatprep.subr.bf16.mxu0 %v1230_v3  ;;  %s1818_s18 = smov (!%p342_p6, %s1067_s18), 31  ;;  %s1068_s13 = sshll.u32 %s1816_s28, 5  ;;  %v1242_v11 = vpack.c.bf16 %v583_v10, %v582_v9  ;;  %v738_v13 = vld [vmem:[%s1781_s6 + $0x8] sm:$0xff]  ;;  %v739_v19 = vld [vmem:[%s1781_s6 + $0x10] sm:$0xff]  ;;  %v740_v20 = vld [vmem:[%s1781_s6 + $0x18] sm:$0xff] }
  0x14   : > { %1233 = vmatpush3.bf16.msra.mxu0 %v1230_v3  ;;  %1239 = vmatprep.subr.bf16.mxu1 %v1238_v8  ;;  %s1475_s14 = sadd.s32 %s1068_s13, %s1818_s18  ;;  %v1247_v16 = vpack.c.bf16 %v738_v13, %v737_v12  ;;  %v1250_v22 = vpack.c.bf16 %v740_v20, %v739_v19  ;;  %s338_s13 = scalar_lea.vmem %s1775_s0, %s1816_s28  ;;  %v1090_v4 = vld [vmem:[%s1780_s5] ss:$0 sm:$0xff] }
  0x15   : > { %1235 = vmatprep.subr.bf16.mxu0 %v1234_v7  ;;  %1241 = vmatpush3.bf16.msra.mxu1 %v1238_v8  ;;  %s1069_s20 = sshll.u32 %s1475_s14, 3  ;;  %v736_v36 = vld [vmem:[%s338_s13] sm:$0x1]  ;;  %v817_v8 = vsub.s32 0, %v816_v1 }
  0x16   : > { %1243 = vmatprep.subr.bf16.mxu1 %v1242_v11  ;;  %s1489_s18 = scalar_lea.vmem %s1776_s1, %s1069_s20  ;;  %v741_v6 = vld [vmem:[%s1782_s7] sm:$0x1]  ;;  %s1682_s23 = scalar_lea.vmem %s1783_s8, %s1069_s20 }
  0x17   : > { %v1492_v14 = vld [vmem:[%s1489_s18] sm:$0xff]  ;;  %v1495_v15 = vld [vmem:[%s1489_s18 + $0x8] sm:$0xff]  ;;  %v1500_v18 = vld [vmem:[%s1489_s18 + $0x10] sm:$0xff] }
  0x18   : > { %1237 = vmatpush3.bf16.msra.mxu0 %v1234_v7  ;;  %1163 = vmatprep.mubr.msk.f32.mxu0 %vm386_vm0, %v1492_v14  ;;  %v1515_v21 = vld [vmem:[%s1489_s18 + $0x18] sm:$0xff]  ;;  %v1520_v23 = vld [vmem:[%s1489_s18 + $0x20] sm:$0xff]  ;;  %v1529_v24 = vld [vmem:[%s1489_s18 + $0x28] sm:$0xff] }
  0x19   : > { %1246 = vmatprep.subr.bf16.mxu0 %v1367_v17  ;;  %1245 = vmatpush3.bf16.msra.mxu1 %v1242_v11  ;;  %v1534_v25 = vld [vmem:[%s1489_s18 + $0x30] sm:$0xff]  ;;  %v1543_v26 = vld [vmem:[%s1489_s18 + $0x38] sm:$0xff]  ;;  %v1548_v27 = vld [vmem:[%s1489_s18 + $0x40] sm:$0xff] }
  0x1a   : > { %1195 = vmatprep.mubr.msk.f32.mxu1 %vm386_vm0, %v1492_v14  ;;  %v1557_v28 = vld [vmem:[%s1489_s18 + $0x48] sm:$0xff]  ;;  %v1562_v29 = vld [vmem:[%s1489_s18 + $0x50] sm:$0xff]  ;;  %v1571_v30 = vld [vmem:[%s1489_s18 + $0x58] sm:$0xff] }
  0x1b   : > { %1164 = vmatmul.mubr.msk.f32.vlgmr.msra.gmra.mrb[0].mxu0 %vm386_vm0, %v1495_v15  ;;  %1789 = vst [vmem:[#allocation2_spill] sm:$0xff] %v1562_v29  ;;  %v1576_v31 = vld [vmem:[%s1489_s18 + $0x60] sm:$0xff]  ;;  %v1585_v32 = vld [vmem:[%s1489_s18 + $0x68] sm:$0xff]  ;;  %v1590_v33 = vld [vmem:[%s1489_s18 + $0x70] sm:$0xff] }
  0x1c   : > { %1248 = vmatpush3.bf16.msra.mxu0 %v1247_v16  ;;  %1166 = vmatprep.mubr.msk.f32.mxu0 %vm386_vm0, %v1500_v18  ;;  %1790 = vst [vmem:[#allocation3_spill] sm:$0xff] %v1576_v31  ;;  %1791 = vst [vmem:[#allocation4_spill] sm:$0xff] %v1585_v32  ;;  %v1599_v34 = vld [vmem:[%s1489_s18 + $0x78] sm:$0xff] }
  0x1d   : > { %1196 = vmatmul.mubr.msk.f32.vlgmr.msra.gmra.mrb[0].mxu1 %vm386_vm0, %v1495_v15  ;;  %1249 = vmatprep.subr.bf16.mxu0 %v1367_v17  ;;  %1792 = vst [vmem:[#allocation5_spill] sm:$0xff] %v1590_v33  ;;  %1793 = vst [vmem:[#allocation6_spill] sm:$0xff] %v1599_v34 }
  0x1e   : > { %1198 = vmatprep.mubr.msk.f32.mxu1 %vm386_vm0, %v1500_v18 }
  0x1f   : > { %1167 = vmatmul.mubr.msk.f32.gmra.mrb[2].mxu0 %vm386_vm0, %v1515_v21 }
  0x20   : > { %1169 = vmatprep.mubr.msk.f32.mxu0 %vm386_vm0, %v1520_v23  ;;  %1251 = vmatpush3.bf16.msra.mxu0 %v1250_v22 }
  0x21   : > { %1199 = vmatmul.mubr.msk.f32.gmra.mrb[2].mxu1 %vm386_vm0, %v1515_v21 }
  0x22   : > { %1201 = vmatprep.mubr.msk.f32.mxu1 %vm386_vm0, %v1520_v23 }
  0x23   : > { %1170 = vmatmul.mubr.msk.f32.gmra.mrb[4].mxu0 %vm386_vm0, %v1529_v24 }
  0x24   : > { %1172 = vmatprep.mubr.msk.f32.mxu0 %vm386_vm0, %v1534_v25 }
  0x25   : > { %1202 = vmatmul.mubr.msk.f32.gmra.mrb[4].mxu1 %vm386_vm0, %v1529_v24 }
  0x26   : > { %1204 = vmatprep.mubr.msk.f32.mxu1 %vm386_vm0, %v1534_v25 }
  0x27   : > { %1173 = vmatmul.mubr.msk.f32.gmra.mrb[6].mxu0 %vm386_vm0, %v1543_v26 }
  0x28   : > { %1175 = vmatprep.mubr.msk.f32.mxu0 %vm386_vm0, %v1548_v27 }
  0x29   : > { %1205 = vmatmul.mubr.msk.f32.gmra.mrb[6].mxu1 %vm386_vm0, %v1543_v26 }
  0x2a   : > { %1207 = vmatprep.mubr.msk.f32.mxu1 %vm386_vm0, %v1548_v27 }
  0x2b   : > { %1176 = vmatmul.mubr.msk.f32.gmra.mrb[8].mxu0 %vm386_vm0, %v1557_v28 }
  0x2c   : > { %1178 = vmatprep.mubr.msk.f32.mxu0 %vm386_vm0, %v1562_v29 }
  0x2d   : > { %1208 = vmatmul.mubr.msk.f32.gmra.mrb[8].mxu1 %vm386_vm0, %v1557_v28 }
  0x2e   : > { %1210 = vmatprep.mubr.msk.f32.mxu1 %vm386_vm0, %v1562_v29 }
  0x2f   : > { %1179 = vmatmul.mubr.msk.f32.gmra.mrb[10].mxu0 %vm386_vm0, %v1571_v30 }
  0x30   : > { %1181 = vmatprep.mubr.msk.f32.mxu0 %vm386_vm0, %v1576_v31 }
  0x31   : > { %1211 = vmatmul.mubr.msk.f32.gmra.mrb[10].mxu1 %vm386_vm0, %v1571_v30 }
  0x32   : > { %1213 = vmatprep.mubr.msk.f32.mxu1 %vm386_vm0, %v1576_v31 }
  0x33   : > { %1182 = vmatmul.mubr.msk.f32.gmra.mrb[12].mxu0 %vm386_vm0, %v1585_v32 }
  0x34   : > { %1184 = vmatprep.mubr.msk.f32.mxu0 %vm386_vm0, %v1590_v33 }
  0x35   : > { %1214 = vmatmul.mubr.msk.f32.gmra.mrb[12].mxu1 %vm386_vm0, %v1585_v32 }
  0x36   : > { %1216 = vmatprep.mubr.msk.f32.mxu1 %vm386_vm0, %v1590_v33 }
  0x37   : > { %1185 = vmatmul.mubr.msk.f32.gmra.mrb[14].mxu0 %vm386_vm0, %v1599_v34 }
  0x38   : > { %1227 = vmatprep.mubr.msk.f32.mxu0 %vm1368_vm1, %v1369_v35 }
  0x39   : > { %1217 = vmatmul.mubr.msk.f32.gmra.mrb[14].mxu1 %vm386_vm0, %v1599_v34 }
  0x3b   : > { %1228 = vmatmul.mubr.msk.f32.vlgmr.msra.gmra.mrb[16].mxu0 %vm386_vm0, %v736_v36 }
  0xee   : > { %v1614_v37 = vpop.f32.mrb[0].mxu0 }
  0xef   : > { %v1616_v38 = vpop.f32.mrb[1].mxu0 }
  0xf0   : > { %v1197_v39 = vpop.f32.mrb[0].mxu1 }
  0xf1   : > { %v657_v40 = vpop.f32.mrb[1].mxu1  ;;  %v663_v10 = vadd.f32 %v1197_v39, %v1090_v4 }
  0xf2   : > { %v1618_v41 = vpop.f32.mrb[2].mxu0  ;;  %v658_v11 = vadd.f32 %v1090_v4, %v657_v40 }
  0xf3   : > { %v1620_v42 = vpop.f32.mrb[3].mxu0 }
  0xf4   : > { %v1200_v43 = vpop.f32.mrb[2].mxu1 }
  0xf5   : > { %v667_v44 = vpop.f32.mrb[3].mxu1  ;;  %v673_v13 = vadd.f32 %v1200_v43, %v1090_v4 }
  0xf6   : > { %v1622_v45 = vpop.f32.mrb[4].mxu0  ;;  %v668_v16 = vadd.f32 %v1090_v4, %v667_v44 }
  0xf7   : > { %v1624_v46 = vpop.f32.mrb[5].mxu0 }
  0xf8   : > { %v1203_v47 = vpop.f32.mrb[4].mxu1 }
  0xf9   : > { %v677_v48 = vpop.f32.mrb[5].mxu1  ;;  %v683_v17 = vadd.f32 %v1203_v47, %v1090_v4 }
  0xfa   : > { %v1626_v49 = vpop.f32.mrb[6].mxu0  ;;  %v678_v22 = vadd.f32 %v1090_v4, %v677_v48 }
  0xfb   : > { %v1628_v50 = vpop.f32.mrb[7].mxu0 }
  0xfc   : > { %v1206_v51 = vpop.f32.mrb[6].mxu1 }
  0xfd   : > { %v687_v52 = vpop.f32.mrb[7].mxu1  ;;  %v693_v35 = vadd.f32 %v1206_v51, %v1090_v4 }
  0xfe   : > { %v1630_v53 = vpop.f32.mrb[8].mxu0  ;;  %v688_v36 = vadd.f32 %v1090_v4, %v687_v52 }
  0xff   : > { %v1632_v54 = vpop.f32.mrb[9].mxu0 }
 0x100   : > { %v1209_v55 = vpop.f32.mrb[8].mxu1 }
 0x101   : > { %v697_v56 = vpop.f32.mrb[9].mxu1  ;;  %v703_v61 = vadd.f32 %v1209_v55, %v1090_v4 }
 0x102   : > { %v1634_v57 = vpop.f32.mrb[10].mxu0  ;;  %v698_v33 = vadd.f32 %v1090_v4, %v697_v56 }
 0x103   : > { %v1636_v58 = vpop.f32.mrb[11].mxu0 }
 0x104   : > { %v1212_v59 = vpop.f32.mrb[10].mxu1 }
 0x105   : > { %v707_v60 = vpop.f32.mrb[11].mxu1  ;;  %v713_v34 = vadd.f32 %v1212_v59, %v1090_v4 }
 0x106   : > { %v1638_v62 = vpop.f32.mrb[12].mxu0  ;;  %v708_v31 = vadd.f32 %v1090_v4, %v707_v60 }
 0x107   : > { %v1640_v63 = vpop.f32.mrb[13].mxu0 }
 0x108   : > { %1794 = vst [vmem:[#allocation7_spill] sm:$0xff] %v1640_v63  ;;  %v1215_v0 = vpop.f32.mrb[12].mxu1 }
 0x109   : > { %v717_v2 = vpop.f32.mrb[13].mxu1  ;;  %v723_v32 = vadd.f32 %v1215_v0, %v1090_v4 }
 0x10a   : > { %v1642_v3 = vpop.f32.mrb[14].mxu0 }
 0x10b   : > { %1795 = vst [vmem:[#allocation8_spill] sm:$0xff] %v1642_v3  ;;  %v1647_v5 = vpop.f32.mrb[15].mxu0  ;;  %v718_v3 = vadd.f32 %v1090_v4, %v717_v2 }
 0x10c   : > { %1796 = vst [vmem:[#allocation9_spill] sm:$0xff] %v1647_v5  ;;  %v1218_v7 = vpop.f32.mrb[14].mxu1 }
 0x10d   : > { %v727_v9 = vpop.f32.mrb[15].mxu1  ;;  %v733_v1 = vadd.f32 %v1218_v7, %v1090_v4 }
 0x10e   : > { %v811_v12 = vpop.f32.mrb[16].mxu0  ;;  %v728_v29 = vadd.f32 %v1090_v4, %v727_v9 }
 0x10f   : > { %v812_v19 = vadd.f32 %v811_v12, %v741_v6  ;;  %v1229_v20 = vpop.f32.mrb[17].mxu0 }
 0x111   : > { %v818_v5 = vrot.slane %v812_v19, %v817_v8 }
 0x113   : > { %v821_v39 = vmul.f32 %v818_v5, %v668_v16  ;;  %v819_v40 = vmul.f32 %v818_v5, %v658_v11  ;;  %v822_v63 = vmul.f32 %v818_v5, %v673_v13  ;;  %v820_v43 = vmul.f32 %v818_v5, %v663_v10 }
 0x114   : > { %v824_v44 = vmul.f32 %v818_v5, %v683_v17  ;;  %v823_v47 = vmul.f32 %v818_v5, %v678_v22  ;;  %v826_v6 = vmul.f32 %v818_v5, %v693_v35  ;;  %v825_v12 = vmul.f32 %v818_v5, %v688_v36 }
 0x115   : > { %v841_v48 = vsel %vm386_vm0, %v821_v39, 0.0  ;;  %v835_v51 = vsel %vm386_vm0, %v819_v40, 0.0  ;;  %v828_v52 = vmul.f32 %v818_v5, %v703_v61  ;;  %v827_v55 = vmul.f32 %v818_v5, %v698_v33 }
 0x116   : > { %842 = vadd.xlane.f32.xlu1 %v841_v48  ;;  %836 = vadd.xlane.f32.xlu0 %v835_v51  ;;  %v830_v56 = vmul.f32 %v818_v5, %v713_v34  ;;  %v829_v59 = vmul.f32 %v818_v5, %v708_v31  ;;  %v832_v60 = vmul.f32 %v818_v5, %v723_v32  ;;  %v844_v7 = vsel %vm386_vm0, %v822_v63, 0.0 }
 0x117   : > { %v831_v0 = vmul.f32 %v818_v5, %v718_v3  ;;  %v834_v2 = vmul.f32 %v818_v5, %v733_v1  ;;  %v833_v4 = vmul.f32 %v818_v5, %v728_v29  ;;  %v838_v8 = vsel %vm386_vm0, %v820_v43, 0.0 }
 0x118   : > { %v850_v9 = vsel %vm386_vm0, %v824_v44, 0.0  ;;  %v847_v10 = vsel %vm386_vm0, %v823_v47, 0.0  ;;  %v856_v33 = vsel %vm386_vm0, %v826_v6, 0.0  ;;  %v853_v31 = vsel %vm386_vm0, %v825_v12, 0.0  ;;  %v1671_v44 = vld [vmem:[%s1778_s3] ss:$0 sm:$0xff] }
 0x119   : > { %v862_v29 = vsel %vm386_vm0, %v828_v52, 0.0  ;;  %v859_v32 = vsel %vm386_vm0, %v827_v55, 0.0  ;;  %v868_v34 = vsel %vm386_vm0, %v830_v56, 0.0  ;;  %v865_v63 = vsel %vm386_vm0, %v829_v59, 0.0 }
 0x11a   : > { %845 = vadd.xlane.f32.xlu1 %v844_v7  ;;  %839 = vadd.xlane.f32.xlu0 %v838_v8  ;;  %v874_v3 = vsel %vm386_vm0, %v832_v60, 0.0  ;;  %v871_v5 = vsel %vm386_vm0, %v831_v0, 0.0  ;;  %v880_v11 = vsel %vm386_vm0, %v834_v2, 0.0  ;;  %v877_v13 = vsel %vm386_vm0, %v833_v4, 0.0 }
 0x11b   : > { %v512_v47 = vadd.f32 %v1671_v44, %v1620_v42  ;;  %v502_v51 = vadd.f32 %v1671_v44, %v1616_v38  ;;  %v517_v60 = vadd.f32 %v1618_v41, %v1671_v44  ;;  %v507_v7 = vadd.f32 %v1614_v37, %v1671_v44 }
 0x11c   : > { %v527_v41 = vadd.f32 %v1622_v45, %v1671_v44  ;;  %v537_v45 = vadd.f32 %v1626_v49, %v1671_v44  ;;  %v547_v49 = vadd.f32 %v1630_v53, %v1671_v44  ;;  %v557_v53 = vadd.f32 %v1634_v57, %v1671_v44 }
 0x11d   : > { %v567_v57 = vadd.f32 %v1638_v62, %v1671_v44  ;;  %v1799_v62 = vld [vmem:[#allocation8_spill] sm:$0xff] }
 0x11e   : > { %851 = vadd.xlane.f32.xlu1 %v850_v9  ;;  %848 = vadd.xlane.f32.xlu0 %v847_v10 }
 0x122   : > { %857 = vadd.xlane.f32.xlu1 %v856_v33  ;;  %854 = vadd.xlane.f32.xlu0 %v853_v31 }
 0x126   : > { %863 = vadd.xlane.f32.xlu1 %v862_v29  ;;  %860 = vadd.xlane.f32.xlu0 %v859_v32 }
 0x12a   : > { %869 = vadd.xlane.f32.xlu1 %v868_v34  ;;  %866 = vadd.xlane.f32.xlu0 %v865_v63  ;;  %v522_v34 = vadd.f32 %v1671_v44, %v1624_v46 }
 0x12e   : > { %875 = vadd.xlane.f32.xlu1 %v874_v3  ;;  %872 = vadd.xlane.f32.xlu0 %v871_v5 }
 0x132   : > { %881 = vadd.xlane.f32.xlu1 %v880_v11  ;;  %878 = vadd.xlane.f32.xlu0 %v877_v13 }
 0x1a3   : > { %v843_v16 = vpop.xlane.xlu1 %842  ;;  %v837_v17 = vpop.xlane.xlu0 %836 }
 0x1a4   : > { %v887_v19 = vmul.f32 1.442695, %v843_v16  ;;  %v883_v20 = vmul.f32 1.442695, %v837_v17 }
 0x1a6   : > { %1295 = vpow2.f32 %v887_v19  ;;  %v532_v19 = vadd.f32 %v1671_v44, %v1628_v50 }
 0x1a7   : > { %1297 = vpow2.f32 %v883_v20  ;;  %v846_v22 = vpop.xlane.xlu1 %845  ;;  %v840_v35 = vpop.xlane.xlu0 %839 }
 0x1a8   : > { %v889_v36 = vmul.f32 1.442695, %v846_v22  ;;  %v885_v61 = vmul.f32 1.442695, %v840_v35 }
 0x1aa   : > { %1299 = vpow2.f32 %v889_v36 }
 0x1ab   : > { %1301 = vpow2.f32 %v885_v61  ;;  %v852_v1 = vpop.xlane.xlu1 %851  ;;  %v849_v39 = vpop.xlane.xlu0 %848 }
 0x1ac   : > { %v893_v40 = vmul.f32 1.442695, %v852_v1  ;;  %v891_v43 = vmul.f32 1.442695, %v849_v39 }
 0x1ae   : > { %1303 = vpow2.f32 %v893_v40  ;;  %v542_v40 = vadd.f32 %v1671_v44, %v1632_v54  ;;  %v552_v54 = vadd.f32 %v1671_v44, %v1636_v58 }
 0x1af   : > { %1305 = vpow2.f32 %v891_v43  ;;  %v858_v6 = vpop.xlane.xlu1 %857  ;;  %v855_v12 = vpop.xlane.xlu0 %854 }
 0x1b0   : > { %v1296_v48 = vpop.eup %1295  ;;  %v897_v52 = vmul.f32 1.442695, %v858_v6  ;;  %v895_v55 = vmul.f32 1.442695, %v855_v12 }
 0x1b1   : > { %v1298_v56 = vpop.eup %1297  ;;  %v917_v59 = vmul.f32 %v1296_v48, %v512_v47 }
 0x1b2   : > { %v915_v42 = vmul.f32 %v1298_v56, %v502_v51  ;;  %1307 = vpow2.f32 %v897_v52 }
 0x1b3   : > { %v933_v0 = vadd.f32 %v917_v59, %v1500_v18  ;;  %1309 = vpow2.f32 %v895_v55  ;;  %v864_v38 = vpop.xlane.xlu1 %863  ;;  %v861_v2 = vpop.xlane.xlu0 %860 }
 0x1b4   : > { %v1300_v4 = vpop.eup %1299  ;;  %v931_v8 = vadd.f32 %v915_v42, %v1492_v14  ;;  %v901_v9 = vmul.f32 1.442695, %v864_v38  ;;  %v899_v10 = vmul.f32 1.442695, %v861_v2 }
 0x1b5   : > { %v1302_v33 = vpop.eup %1301  ;;  %949 = vst.msk [vmem:[%s1682_s23 + $0x10] sm:$0xff] %vm386_vm0, %v933_v0  ;;  %v918_v31 = vmul.f32 %v1300_v4, %v517_v60  ;;  %v1797_v60 = vld [vmem:[#allocation7_spill] sm:$0xff]  ;;  %v1798_v0 = vld [vmem:[#allocation2_spill] sm:$0xff] }
 0x1b6   : > { %947 = vst.msk [vmem:[%s1682_s23] sm:$0xff] %vm386_vm0, %v931_v8  ;;  %v916_v18 = vmul.f32 %v1302_v33, %v507_v7  ;;  %1311 = vpow2.f32 %v901_v9  ;;  %v562_v58 = vadd.f32 %v1671_v44, %v1797_v60  ;;  %v577_v7 = vadd.f32 %v1799_v62, %v1671_v44 }
 0x1b7   : > { %v934_v29 = vadd.f32 %v918_v31, %v1515_v21  ;;  %1313 = vpow2.f32 %v899_v10  ;;  %v870_v37 = vpop.xlane.xlu1 %869  ;;  %v867_v14 = vpop.xlane.xlu0 %866  ;;  %v1801_v10 = vld [vmem:[#allocation9_spill] sm:$0xff]  ;;  %v1802_v31 = vld [vmem:[#allocation3_spill] sm:$0xff] }
 0x1b8   : > { %v1304_v32 = vpop.eup %1303  ;;  %v932_v63 = vadd.f32 %v916_v18, %v1495_v15  ;;  %v905_v3 = vmul.f32 1.442695, %v870_v37  ;;  %v903_v5 = vmul.f32 1.442695, %v867_v14  ;;  %v572_v33 = vadd.f32 %v1671_v44, %v1801_v10  ;;  %v1803_v14 = vld [vmem:[#allocation6_spill] sm:$0xff] }
 0x1b9   : > { %v1306_v11 = vpop.eup %1305  ;;  %950 = vst.msk [vmem:[%s1682_s23 + $0x18] sm:$0xff] %vm386_vm0, %v934_v29  ;;  %v920_v13 = vmul.f32 %v1304_v32, %v527_v41 }
 0x1ba   : > { %948 = vst.msk [vmem:[%s1682_s23 + $0x8] sm:$0xff] %vm386_vm0, %v932_v63  ;;  %v919_v21 = vmul.f32 %v1306_v11, %v522_v34  ;;  %1315 = vpow2.f32 %v905_v3  ;;  %v1804_v34 = vld [vmem:[#allocation5_spill] sm:$0xff] }
 0x1bb   : > { %v936_v16 = vadd.f32 %v920_v13, %v1529_v24  ;;  %1317 = vpow2.f32 %v903_v5  ;;  %v876_v46 = vpop.xlane.xlu1 %875  ;;  %v873_v15 = vpop.xlane.xlu0 %872 }
 0x1bc   : > { %v1308_v17 = vpop.eup %1307  ;;  %v935_v20 = vadd.f32 %v919_v21, %v1520_v23  ;;  %v909_v22 = vmul.f32 1.442695, %v876_v46  ;;  %v907_v35 = vmul.f32 1.442695, %v873_v15 }
 0x1bd   : > { %v1310_v36 = vpop.eup %1309  ;;  %952 = vst.msk [vmem:[%s1682_s23 + $0x28] sm:$0xff] %vm386_vm0, %v936_v16  ;;  %v922_v61 = vmul.f32 %v1308_v17, %v537_v45 }
 0x1be   : > { %951 = vst.msk [vmem:[%s1682_s23 + $0x20] sm:$0xff] %vm386_vm0, %v935_v20  ;;  %v921_v24 = vmul.f32 %v1310_v36, %v532_v19  ;;  %1319 = vpow2.f32 %v909_v22 }
 0x1bf   : > { %v938_v1 = vadd.f32 %v922_v61, %v1543_v26  ;;  %1321 = vpow2.f32 %v907_v35  ;;  %v882_v50 = vpop.xlane.xlu1 %881  ;;  %v879_v23 = vpop.xlane.xlu0 %878 }
 0x1c0   : > { %v1312_v39 = vpop.eup %1311  ;;  %v937_v43 = vadd.f32 %v921_v24, %v1534_v25  ;;  %v913_v47 = vmul.f32 1.442695, %v882_v50  ;;  %v911_v6 = vmul.f32 1.442695, %v879_v23 }
 0x1c1   : > { %v1314_v12 = vpop.eup %1313  ;;  %954 = vst.msk [vmem:[%s1682_s23 + $0x38] sm:$0xff] %vm386_vm0, %v938_v1  ;;  %v924_v48 = vmul.f32 %v1312_v39, %v547_v49 }
 0x1c2   : > { %953 = vst.msk [vmem:[%s1682_s23 + $0x30] sm:$0xff] %vm386_vm0, %v937_v43  ;;  %v923_v26 = vmul.f32 %v1314_v12, %v542_v40  ;;  %1323 = vpow2.f32 %v913_v47 }
 0x1c3   : > { %v940_v51 = vadd.f32 %v924_v48, %v1557_v28  ;;  %1325 = vpow2.f32 %v911_v6 }
 0x1c4   : > { %v1316_v25 = vpop.eup %1315  ;;  %v939_v52 = vadd.f32 %v923_v26, %v1548_v27 }
 0x1c5   : > { %v1318_v55 = vpop.eup %1317  ;;  %956 = vst.msk [vmem:[%s1682_s23 + $0x48] sm:$0xff] %vm386_vm0, %v940_v51  ;;  %v926_v56 = vmul.f32 %v1316_v25, %v557_v53 }
 0x1c6   : > { %955 = vst.msk [vmem:[%s1682_s23 + $0x40] sm:$0xff] %vm386_vm0, %v939_v52  ;;  %v925_v59 = vmul.f32 %v1318_v55, %v552_v54 }
 0x1c7   : > { %v942_v28 = vadd.f32 %v926_v56, %v1571_v30  ;;  %v1800_v30 = vld [vmem:[#allocation4_spill] sm:$0xff] }
 0x1c8   : > { %v1320_v42 = vpop.eup %1319  ;;  %v941_v27 = vadd.f32 %v925_v59, %v1798_v0 }
 0x1c9   : > { %v1322_v38 = vpop.eup %1321  ;;  %958 = vst.msk [vmem:[%s1682_s23 + $0x58] sm:$0xff] %vm386_vm0, %v942_v28  ;;  %v928_v2 = vmul.f32 %v1320_v42, %v567_v57 }
 0x1ca   : > { %957 = vst.msk [vmem:[%s1682_s23 + $0x50] sm:$0xff] %vm386_vm0, %v941_v27  ;;  %v927_v4 = vmul.f32 %v1322_v38, %v562_v58 }
 0x1cb   : > { %v944_v8 = vadd.f32 %v928_v2, %v1800_v30 }
 0x1cc   : > { %v1324_v9 = vpop.eup %1323  ;;  %v943_v18 = vadd.f32 %v927_v4, %v1802_v31 }
 0x1cd   : > { %v1326_v41 = vpop.eup %1325  ;;  %960 = vst.msk [vmem:[%s1682_s23 + $0x68] sm:$0xff] %vm386_vm0, %v944_v8  ;;  %v930_v29 = vmul.f32 %v1324_v9, %v577_v7 }
 0x1ce   : > { %959 = vst.msk [vmem:[%s1682_s23 + $0x60] sm:$0xff] %vm386_vm0, %v943_v18  ;;  %v929_v37 = vmul.f32 %v1326_v41, %v572_v33 }
 0x1cf   : > { %v946_v32 = vadd.f32 %v930_v29, %v1803_v14 }
 0x1d0   : > { %v945_v63 = vadd.f32 %v929_v37, %v1804_v34 }
 0x1d1   : > { %962 = vst.msk [vmem:[%s1682_s23 + $0x78] sm:$0xff] %vm386_vm0, %v946_v32 }
 0x1d2   : > { %961 = vst.msk [vmem:[%s1682_s23 + $0x70] sm:$0xff] %vm386_vm0, %v945_v63 }
 0x1d3 PF: > { %s18_s9 = sadd.s32 1, %s1365_s9   ;;  %s1805_s27 = smov %s1357_s29 }
 0x1d4   : > { %p15_p7 = scmp.ge.s32.totalorder %s18_s9, 6   ;;  %s1806_s28 = smov %s1361_s30 }
 0x1d5   : > { %s1807_s29 = smov %s1810_s10  ;;  %s1808_s30 = smov %s1814_s11 }
 0x1d6   :  { %17 = sbr.rel (!%p15_p7) target bundleno = 3 (0x3), region = 85 }

</bundles_post_ra>
